<compile_context>
chip_gen: v6e
topology: v6e:2x2x1
jax: 0.10.0
libtpu: 0.0.40
codegen_flags: <defaults>
</compile_context>

<pallas_src>
import functools

import jax
import jax.numpy as jnp
from jax.experimental import pallas as pl
from jax.experimental.pallas import tpu as pltpu


def _bn_kernel(x_ref, gamma_ref, beta_ref, o_ref, *, eps):
    # x_ref: (N, C_TILE, HW) ; gamma_ref / beta_ref: (1, C_TILE, 1)
    x = x_ref[...].astype(jnp.float32)  # no-op for f32 inputs

    n_red = x.shape[0] * x.shape[2]
    inv_count = jnp.float32(1.0 / n_red)

    # Per-channel mean / biased (unbiased=False) variance over (N, H*W).
    # Lane-axis reduce first (XLU), then the small leading-axis reduce (VPU).
    mean = jnp.sum(jnp.sum(x, axis=2, keepdims=True), axis=0, keepdims=True) * inv_count
    diff = x - mean
    var = jnp.sum(jnp.sum(diff * diff, axis=2, keepdims=True), axis=0, keepdims=True) * inv_count
    inv_std = jax.lax.rsqrt(var + eps)

    gamma = gamma_ref[...].astype(jnp.float32)
    beta = beta_ref[...].astype(jnp.float32)

    # Fold gamma * inv_std and the mean/beta terms into a single per-channel
    # scale + shift so the per-element normalize path is x * scale + shift
    # (2 VALU ops instead of 4).
    scale = gamma * inv_std            # (1, C_TILE, 1)
    shift = beta - mean * scale        # (1, C_TILE, 1)
    o_ref[...] = (x * scale + shift).astype(o_ref.dtype)


def _pick_c_tile(N, C, HW, itemsize, vmem_budget_bytes):
    """Largest channel tile whose double-buffered blocks stay inside VMEM."""
    sublane = 8 if itemsize >= 4 else (16 if itemsize == 2 else 32)

    def fits(ct):
        block_bytes = N * ct * HW * itemsize
        f32_bytes = N * ct * HW * 4  # f32 compute copy / diff temporary
        # in + out blocks, double-buffered, plus in-kernel f32 temporaries.
        return 2 * 2 * block_bytes + 2 * f32_bytes <= vmem_budget_bytes

    if fits(C):
        return C
    # Largest sublane-aligned divisor of C that fits (keeps (8,128) tiling and
    # full vreg sublane occupancy).
    ct = (C // sublane) * sublane
    while ct >= sublane:
        if C % ct == 0 and fits(ct):
            return ct
        ct -= sublane
    # TODO(synk): for activations where even one sublane-group of channels
    # exceeds VMEM (N*H*W too large), switch to a two-pass streaming reduction
    # (pass 1: accumulate per-channel sum/sumsq over M-chunks, pass 2: apply
    # scale/shift). Fall back to a single full-C block here.
    return C


def batch_norm_2d(x, gamma, beta, eps=1e-5, c_tile=None):
    """BatchNorm2d forward. x: (N, C, H, W), gamma/beta: (C,)."""
    assert x.ndim == 4
    N, C, H, W = x.shape
    HW = H * W

    # NCHW -> (N, C, H*W): pure reshape, no HBM traffic.
    x3 = x.reshape(N, C, HW)
    gamma3 = gamma.reshape(1, C, 1)
    beta3 = beta.reshape(1, C, 1)

    # 48 MiB scoped VMEM is safe on v5e/v6e (128 MiB physical) and v7x (64 MiB);
    # tile selection budgets a bit below that to keep double-buffering alive.
    vmem_limit = 48 * 1024 * 1024
    if c_tile is None:
        c_tile = _pick_c_tile(N, C, HW, x.dtype.itemsize,
                              vmem_budget_bytes=40 * 1024 * 1024)
    grid = (pl.cdiv(C, c_tile),)

    kernel = functools.partial(_bn_kernel, eps=eps)

    out3 = pl.pallas_call(
        kernel,
        out_shape=jax.ShapeDtypeStruct((N, C, HW), x.dtype),
        grid=grid,
        in_specs=[
            pl.BlockSpec((N, c_tile, HW), lambda c: (0, c, 0)),
            pl.BlockSpec((1, c_tile, 1), lambda c: (0, c, 0)),
            pl.BlockSpec((1, c_tile, 1), lambda c: (0, c, 0)),
        ],
        out_specs=pl.BlockSpec((N, c_tile, HW), lambda c: (0, c, 0)),
        compiler_params=pltpu.CompilerParams(
            # Channel tiles are fully independent -> let Mosaic shard them
            # across both TensorCores on v7x (harmless on v5e/v6e).
            dimension_semantics=("parallel",),
            vmem_limit_bytes=vmem_limit,
        ),
    )(x3, gamma3, beta3)

    return out3.reshape(N, C, H, W)


def _reference(x, gamma, beta, eps=1e-5):
    dims = (0, 2, 3)
    mean = jnp.mean(x, axis=dims, keepdims=True)
    var = jnp.mean((x - mean) ** 2, axis=dims, keepdims=True)
    x_hat = (x - mean) / jnp.sqrt(var + eps)
    return gamma.reshape(1, -1, 1, 1) * x_hat + beta.reshape(1, -1, 1, 1)


if __name__ == "__main__":
    key = jax.random.PRNGKey(0)

    # Small shape matching the module's forward (batch=2, channels=4, 16x16).
    N, C, H, W = 2, 4, 16, 16
    x = jax.random.normal(key, (N, C, H, W), dtype=jnp.float32)
    gamma = jnp.ones((C,), dtype=jnp.float32)   # nn.Parameter(torch.ones)
    beta = jnp.zeros((C,), dtype=jnp.float32)   # nn.Parameter(torch.zeros)

    out = batch_norm_2d(x, gamma, beta, eps=1e-5)
    out = jax.block_until_ready(out)
    ref = _reference(x, gamma, beta, eps=1e-5)
    assert out.shape == (N, C, H, W)
    assert jnp.allclose(out, ref, atol=1e-5, rtol=1e-5)

    # Also exercise the multi-step channel-tiled (double-buffered) path.
    k2 = jax.random.PRNGKey(1)
    N2, C2, H2, W2 = 2, 16, 16, 16
    x2 = jax.random.normal(k2, (N2, C2, H2, W2), dtype=jnp.float32)
    g2 = jax.random.normal(jax.random.PRNGKey(2), (C2,), dtype=jnp.float32)
    b2 = jax.random.normal(jax.random.PRNGKey(3), (C2,), dtype=jnp.float32)
    out2 = jax.block_until_ready(batch_norm_2d(x2, g2, b2, eps=1e-5, c_tile=8))
    ref2 = _reference(x2, g2, b2, eps=1e-5)
    assert jnp.allclose(out2, ref2, atol=1e-5, rtol=1e-5)

    print("KERNEL_OK")
</pallas_src>

<mosaic_0001>
module attributes {stable_mosaic.version = 11 : i64} {
  func.func @_bn_kernel(%arg0: i32, %arg1: memref<2x4x256xf32, #tpu.memory_space<vmem>>, %arg2: memref<1x4x1xf32, #tpu.memory_space<vmem>>, %arg3: memref<1x4x1xf32, #tpu.memory_space<vmem>>, %arg4: memref<2x4x256xf32, #tpu.memory_space<vmem>>) attributes {dimension_semantics = [#tpu.dimension_semantics<parallel>], iteration_bounds = array<i64: 1>, scalar_prefetch = 0 : i64, scratch_operands = 0 : i64, tpu.core_type = #tpu.core_type<tc>, window_params = [{transform_indices = @transform_0, window_bounds = array<i64: 2, 4, 256>}, {transform_indices = @transform_1, window_bounds = array<i64: 1, 4, 1>}, {transform_indices = @transform_2, window_bounds = array<i64: 1, 4, 1>}, {transform_indices = @transform_3, window_bounds = array<i64: 2, 4, 256>}]} {
    %c0 = arith.constant 0 : index
    %c0_0 = arith.constant 0 : index
    %c0_1 = arith.constant 0 : index
    %0 = vector.load %arg1[%c0, %c0_0, %c0_1] : memref<2x4x256xf32, #tpu.memory_space<vmem>>, vector<2x4x256xf32>
    %cst = arith.constant dense<0.000000e+00> : vector<2x4xf32>
    %1 = vector.multi_reduction <add>, %0, %cst [2] : vector<2x4x256xf32> to vector<2x4xf32>
    %2 = vector.shape_cast %1 : vector<2x4xf32> to vector<2x4x1xf32>
    %cst_2 = arith.constant dense<0.000000e+00> : vector<4x1xf32>
    %3 = vector.multi_reduction <add>, %2, %cst_2 [0] : vector<2x4x1xf32> to vector<4x1xf32>
    %4 = vector.shape_cast %3 : vector<4x1xf32> to vector<1x4x1xf32>
    %cst_3 = arith.constant 0.001953125 : f32
    %5 = vector.broadcast %cst_3 : f32 to vector<1x4x1xf32>
    %6 = arith.mulf %4, %5 : vector<1x4x1xf32>
    %7 = vector.broadcast %6 : vector<1x4x1xf32> to vector<2x4x256xf32>
    %8 = arith.subf %0, %7 : vector<2x4x256xf32>
    %9 = arith.mulf %8, %8 : vector<2x4x256xf32>
    %cst_4 = arith.constant dense<0.000000e+00> : vector<2x4xf32>
    %10 = vector.multi_reduction <add>, %9, %cst_4 [2] : vector<2x4x256xf32> to vector<2x4xf32>
    %11 = vector.shape_cast %10 : vector<2x4xf32> to vector<2x4x1xf32>
    %cst_5 = arith.constant dense<0.000000e+00> : vector<4x1xf32>
    %12 = vector.multi_reduction <add>, %11, %cst_5 [0] : vector<2x4x1xf32> to vector<4x1xf32>
    %13 = vector.shape_cast %12 : vector<4x1xf32> to vector<1x4x1xf32>
    %cst_6 = arith.constant 0.001953125 : f32
    %14 = vector.broadcast %cst_6 : f32 to vector<1x4x1xf32>
    %15 = arith.mulf %13, %14 : vector<1x4x1xf32>
    %cst_7 = arith.constant 9.99999974E-6 : f32
    %16 = vector.broadcast %cst_7 : f32 to vector<1x4x1xf32>
    %17 = arith.addf %15, %16 : vector<1x4x1xf32>
    %18 = math.rsqrt %17 : vector<1x4x1xf32>
    %c0_8 = arith.constant 0 : index
    %c0_9 = arith.constant 0 : index
    %c0_10 = arith.constant 0 : index
    %19 = vector.load %arg2[%c0_8, %c0_9, %c0_10] : memref<1x4x1xf32, #tpu.memory_space<vmem>>, vector<1x4x1xf32>
    %c0_11 = arith.constant 0 : index
    %c0_12 = arith.constant 0 : index
    %c0_13 = arith.constant 0 : index
    %20 = vector.load %arg3[%c0_11, %c0_12, %c0_13] : memref<1x4x1xf32, #tpu.memory_space<vmem>>, vector<1x4x1xf32>
    %21 = arith.mulf %19, %18 : vector<1x4x1xf32>
    %22 = arith.mulf %6, %21 : vector<1x4x1xf32>
    %23 = arith.subf %20, %22 : vector<1x4x1xf32>
    %24 = vector.broadcast %21 : vector<1x4x1xf32> to vector<2x4x256xf32>
    %25 = arith.mulf %0, %24 : vector<2x4x256xf32>
    %26 = vector.broadcast %23 : vector<1x4x1xf32> to vector<2x4x256xf32>
    %27 = arith.addf %25, %26 : vector<2x4x256xf32>
    %c0_14 = arith.constant 0 : index
    %c0_15 = arith.constant 0 : index
    %c0_16 = arith.constant 0 : index
    %28 = vector.load %arg4[%c0_14, %c0_15, %c0_16] : memref<2x4x256xf32, #tpu.memory_space<vmem>>, vector<2x4x256xf32>
    tpu.vector_store %arg4[%c0_14, %c0_15, %c0_16], %27 {strides = array<i32>} : memref<2x4x256xf32, #tpu.memory_space<vmem>>, vector<2x4x256xf32>,
    return
  }
  func.func @transform_0(%arg0: i32) -> (i32, i32, i32) {
    %c0_i32 = arith.constant 0 : i32
    %c0_i32_0 = arith.constant 0 : i32
    %c0_i32_1 = arith.constant 0 : i32
    return %c0_i32, %arg0, %c0_i32_0 : i32, i32, i32
  }
  func.func @transform_1(%arg0: i32) -> (i32, i32, i32) {
    %c0_i32 = arith.constant 0 : i32
    %c0_i32_0 = arith.constant 0 : i32
    %c0_i32_1 = arith.constant 0 : i32
    return %c0_i32, %arg0, %c0_i32_0 : i32, i32, i32
  }
  func.func @transform_2(%arg0: i32) -> (i32, i32, i32) {
    %c0_i32 = arith.constant 0 : i32
    %c0_i32_0 = arith.constant 0 : i32
    %c0_i32_1 = arith.constant 0 : i32
    return %c0_i32, %arg0, %c0_i32_0 : i32, i32, i32
  }
  func.func @transform_3(%arg0: i32) -> (i32, i32, i32) {
    %c0_i32 = arith.constant 0 : i32
    %c0_i32_0 = arith.constant 0 : i32
    %c0_i32_1 = arith.constant 0 : i32
    return %c0_i32, %arg0, %c0_i32_0 : i32, i32, i32
  }
}

</mosaic_0001>

<bundles_post_ra>
// kernel: tpu_custom_call.1
= control target key start
LH: loop header
LB: loop body
LE: loop exit
PB: predicated region body
PF: predicated region fallthrough
CT: control target
= control target key end

     0   :  { %8 = vsyncpa [#allocation3], 0  ;;  %s265_s0 = inlined_call_operand.hbm [shape: f32[2,4,256], index: 0, kind: input, shape index: {}]   ;;  %s266_s1 = inlined_call_operand.vmem [shape: f32[1,4,1], index: 1, kind: input, shape index: {}]   ;;  %s267_s2 = inlined_call_operand.vmem [shape: f32[1,4,1], index: 2, kind: input, shape index: {}]   ;;  %s268_s3 = inlined_call_operand.hbm [shape: f32[2,4,256], index: 3, kind: output, shape index: {}]  }
   0x1   :  { %9 = vsyncpa [#allocation4], 0  ;;  %s195_s12 = smov [#allocation2]  }
   0x2   :  { %s15_s13 = sshll.u32 %s195_s12, 4  ;;  %s16_s13 = int_to_ptr.vmem [resolvable:$true] %s15_s13 }
   0x3   :  { %s159_s14 = scalar_lea.vmem %s16_s13, 256  ;;  %p164_p1 = scmp.lt.s32.totalorder %s16_s13, %s16_s13 }
   0x4   :  { %p160_p0 = scmp.ne.s32.totalorder %s16_s13, %s159_s14  ;;  %p165_p2 = scmp.lt.s32.totalorder %s159_s14, %s159_s14 }
   0x6   :  { %p166_p3 = por %p165_p2, %p164_p1 }
   0x8   :  { %p167_p4 = pnand %p166_p3, %p160_p0 }
   0xa   :  { %170 = shalt.err (!%p167_p4)
}
   0xb   :  { %s196_s15 = smov 128   ;;  %s197_s16 = smov 8  }
   0xc   :  { %21 = dma.hbm_to_vmem [thread:$0]  %s265_s0, 256, %s16_s13, [#allocation3], %s196_s15, %s196_s15, %s197_s16  }
   0xd   :  { %191 = dma.done.wait [#allocation3], 256  }
   0xe   :  { %192 = vsyncadd [#allocation3], 4294967040  ;;  %vm37_vm0 = vcmask 1043456   ;;  %v227_v0 = vld [vmem:[#allocation2] sm:$0xff]  ;;  %v229_v1 = vld [vmem:[#allocation2 + $0x8] sm:$0xff]  ;;  %v56_v12 = vlaneseq  ;;  %v199_v35 = vmov 0  }
   0xf   :  { %v33_v2 = vcombine.high %v227_v0, %v227_v0  ;;  %v38_v3 = vsel %vm37_vm0, %v227_v0, 0.0  ;;  %v34_v4 = vcombine.high %v229_v1, %v229_v1  ;;  %v43_v6 = vsel %vm37_vm0, %v229_v1, 0.0  ;;  %145 = vset.pattern.permute.xlu0 %v199_v35  ;;  %146 = vset.pattern.permute.xlu1 %v199_v35  ;;  %v87_v43 = vld [vmem:[%s266_s1] sm:$0xf]  ;;  %s200_s22 = smov [#allocation5]  }
  0x10   :  { %v198_v10 = vmov 839922192   ;;  %v57_v15 = vshrl.u32 %v56_v12, 7  ;;  %v88_v46 = vld [vmem:[%s267_s2] sm:$0xf]  ;;  %s127_s23 = sshll.u32 %s200_s22, 4  ;;  %s128_s23 = int_to_ptr.vmem [resolvable:$true] %s127_s23 }
  0x11   :  { %v39_v5 = vsel %vm37_vm0, %v33_v2, 0.0  ;;  %v44_v7 = vsel %vm37_vm0, %v34_v4, 0.0  ;;  %v54_v11 = vunpack.c.l.s4 %v198_v10  ;;  %s171_s1 = scalar_lea.vmem %s128_s23, 256  ;;  %p176_p6 = scmp.lt.s32.totalorder %s128_s23, %s128_s23 }
  0x12   :  { %v40_v8 = vadd.f32 %v39_v5, %v38_v3  ;;  %v45_v9 = vadd.f32 %v44_v7, %v43_v6  ;;  %p172_p5 = scmp.ne.s32.totalorder %s128_s23, %s171_s1  ;;  %p177_p7 = scmp.lt.s32.totalorder %s171_s1, %s171_s1 }
  0x13   :  { %v55_v14 = vunpack.c.0.s8 %v54_v11 }
  0x14   :  { %41 = vadd.xlane.f32.xlu0 %v40_v8  ;;  %p178_p8 = por %p177_p7, %p176_p6 }
  0x15   :  { %v58_v19 = vsub.s32 %v55_v14, %v57_v15 }
  0x16   :  { %p179_p9 = pnand %p178_p8, %p172_p5 }
  0x18   :  { %46 = vadd.xlane.f32.xlu0 %v45_v9 }
  0x9d   :  { %v42_v13 = vpop.xlane.xlu0 %41 }
  0x9e   :  { %v48_v17 = vsel %vm37_vm0, %v42_v13, 0.0 }
  0xa1   :  { %v47_v16 = vpop.xlane.xlu0 %46 }
  0xa2   :  { %v49_v18 = vsel %vm37_vm0, %v47_v16, 0.0 }
  0xa3   :  { %v50_v20 = vadd.f32 %v49_v18, %v48_v17 }
  0xa5   :  { %v51_v21 = vmul.f32 0.001953125, %v50_v20 }
  0xa7   :  { %v59_v22 = vrot.slane %v51_v21, %v58_v19 }
  0xa9   :  { %v61_v23 = vsub.f32 %v227_v0, %v59_v22  ;;  %v62_v24 = vsub.f32 %v229_v1, %v59_v22 }
  0xab   :  { %v63_v25 = vmul.f32 %v61_v23, %v61_v23  ;;  %v64_v26 = vmul.f32 %v62_v24, %v62_v24 }
  0xad   :  { %v67_v27 = vcombine.high %v63_v25, %v63_v25  ;;  %v68_v28 = vcombine.high %v64_v26, %v64_v26  ;;  %v71_v29 = vsel %vm37_vm0, %v63_v25, 0.0  ;;  %v76_v33 = vsel %vm37_vm0, %v64_v26, 0.0 }
  0xaf   :  { %v72_v30 = vsel %vm37_vm0, %v67_v27, 0.0  ;;  %v77_v32 = vsel %vm37_vm0, %v68_v28, 0.0 }
  0xb0   :  { %v73_v31 = vadd.f32 %v72_v30, %v71_v29  ;;  %v78_v34 = vadd.f32 %v77_v32, %v76_v33 }
  0xb2   :  { %74 = vadd.xlane.f32.xlu1 %v73_v31 }
  0xb6   :  { %79 = vadd.xlane.f32.xlu1 %v78_v34 }
 0x13b   :  { %v75_v36 = vpop.xlane.xlu1 %74 }
 0x13c   :  { %v81_v38 = vsel %vm37_vm0, %v75_v36, 0.0 }
 0x13f   :  { %v80_v37 = vpop.xlane.xlu1 %79 }
 0x140   :  { %v82_v39 = vsel %vm37_vm0, %v80_v37, 0.0 }
 0x141   :  { %v83_v40 = vadd.f32 %v82_v39, %v81_v38 }
 0x143   :  { %v84_v41 = vmul.f32 0.001953125, %v83_v40 }
 0x145   :  { %v85_v42 = vadd.f32 1e-05, %v84_v41 }
 0x147   :  { %149 = vrsqrt.f32 %v85_v42 }
 0x154   :  { %v150_v44 = vpop.eup %149 }
 0x155   :  { %v89_v45 = vmul.f32 %v150_v44, %v87_v43 }
 0x157   :  { %94 = vperm.xlu0 %145, %v89_v45   ;;  %v90_v47 = vmul.f32 %v89_v45, %v51_v21 }
 0x159   :  { %v91_v48 = vsub.f32 %v88_v46, %v90_v47 }
 0x15b   :  { %108 = vperm.xlu1 %146, %v91_v48  }
 0x1d2   :  { %v95_v49 = vpop.permute.xlu0 %94 }
 0x1d3   :  { %v102_v50 = vrot.slane %v95_v49, %v58_v19 }
 0x1d5   :  { %v104_v52 = vmul.f32 %v102_v50, %v227_v0  ;;  %v105_v53 = vmul.f32 %v102_v50, %v229_v1 }
 0x1d6   :  { %v109_v51 = vpop.permute.xlu1 %108 }
 0x1d7   :  { %v116_v54 = vrot.slane %v109_v51, %v58_v19 }
 0x1d9   :  { %v118_v55 = vadd.f32 %v116_v54, %v104_v52  ;;  %v119_v56 = vadd.f32 %v116_v54, %v105_v53 }
 0x1db   :  { %120 = vst [vmem:[#allocation5] sm:$0xff] %v118_v55  ;;  %121 = vst [vmem:[#allocation5 + $0x8] sm:$0xff] %v119_v56 }
 0x1dc   :  { %182 = shalt.err (!%p179_p9)
}
 0x1dd   :  { %133 = dma.vmem_to_hbm [thread:$0]  %s128_s23, 256, %s268_s3, [#allocation4], %s196_s15, %s196_s15, %s197_s16  }
 0x1de   :  { %193 = dma.done.wait [#allocation4], 256  }
 0x1df   :  { %194 = vsyncadd [#allocation4], 4294967040 }
 0x1e0   :  { %137 = vsyncpa [#allocation3], 1 }
 0x1e1   :  { %138 = vsyncpa [#allocation4], 1 }

</bundles_post_ra>
